<compile_context>
chip_gen: v6e
topology: v6e:2x2x1
jax: 0.10.0
libtpu: 0.0.40
codegen_flags: <defaults>
</compile_context>

<pallas_src>
import jax
import jax.numpy as jnp
from jax.experimental import pallas as pl
from jax.experimental.pallas import tpu as pltpu

_NEG_BIG = jnp.float32(-1e30)   # "-inf" sentinel for padded class columns
_TB_ALIGN = 16                  # bf16 sublane packing: 2nd-minor tile of 16


def _round_up(n, m):
    return ((n + m - 1) // m) * m


def _linear_logsoftmax_kernel(x_ref, w_ref, b_ref, o_ref):
    # x_ref: (TB, D) bf16   w_ref: (D, C_pad) bf16
    # b_ref: (1, C_pad) f32 o_ref: (TB, C_pad) f32
    logits = jnp.dot(x_ref[...], w_ref[...],
                     preferred_element_type=jnp.float32) + b_ref[...]
    # Numerically stable log-softmax over the class axis (dim=1), in f32.
    # (-1e30 bias on padded class columns -> they never win the max and
    #  exp() underflows to exactly 0, so they are inert.)
    m = jnp.max(logits, axis=1, keepdims=True)
    shifted = logits - m
    lse = jnp.log(jnp.sum(jnp.exp(shifted), axis=1, keepdims=True))
    o_ref[...] = (shifted - lse).astype(o_ref.dtype)


def _vmem_capacity_bytes():
    try:
        return int(pltpu.get_tpu_info().vmem_capacity_bytes)
    except Exception:
        return 128 << 20   # v5e/v6e default


def linear_logsoftmax(x, w, b, *, block_b=256):
    """x: (B, D), w: (D, C), b: (C,) -> log_softmax(x @ w + b, axis=1), f32."""
    B, D = x.shape
    C = w.shape[1]

    # Class (lane) axis is the only one that genuinely needs padding.
    C_pad = _round_up(C, 128)

    # Batch tiling: tight B_pad, and >= 2 grid steps when the batch allows so
    # both v7x TensorCores get work on the "parallel" axis.
    num_steps = max(pl.cdiv(B, block_b), 2 if B >= 2 * _TB_ALIGN else 1)
    TB = _round_up(pl.cdiv(B, num_steps), _TB_ALIGN)
    B_pad = _round_up(B, TB)
    grid = (B_pad // TB,)

    # Inputs: bf16 for the MXU; pad only where misaligned.
    x_bf = x.astype(jnp.bfloat16)
    if B_pad != B:
        x_bf = jnp.zeros((B_pad, D), jnp.bfloat16).at[:B].set(x_bf)
    w_bf = w.astype(jnp.bfloat16)
    if C_pad != C:
        w_bf = jnp.zeros((D, C_pad), jnp.bfloat16).at[:, :C].set(w_bf)
        b_p = jnp.full((1, C_pad), _NEG_BIG, jnp.float32).at[0, :C].set(
            b.astype(jnp.float32))
    else:
        b_p = b.astype(jnp.float32).reshape(1, C_pad)

    cost = pl.CostEstimate(
        flops=2 * B_pad * D * C_pad,
        transcendentals=B_pad * C_pad,
        bytes_accessed=2 * (B_pad * D + D * C_pad) + 4 * (C_pad + B_pad * C_pad),
    )

    vmem_cap = _vmem_capacity_bytes()

    def run(w_buffers):
        # x/out tiles are double-buffered by the pipeline; W/b use w_buffers.
        vmem_needed = (
            2 * TB * D * 2                 # x tiles (bf16, double-buffered)
            + 2 * TB * C_pad * 4           # out tiles (f32, double-buffered)
            + w_buffers * D * C_pad * 2    # resident weight (bf16)
            + w_buffers * C_pad * 4        # resident bias (f32)
            + 3 * TB * C_pad * 4)          # logits/shifted/exp temporaries
        vmem_limit = max(16 << 20,
                         min(vmem_needed + (4 << 20), int(vmem_cap * 0.75)))

        if w_buffers == 1:
            w_spec = pl.BlockSpec((D, C_pad), lambda i: (0, 0),
                                  pipeline_mode=pl.Buffered(1))
            b_spec = pl.BlockSpec((1, C_pad), lambda i: (0, 0),
                                  pipeline_mode=pl.Buffered(1))
        else:
            w_spec = pl.BlockSpec((D, C_pad), lambda i: (0, 0))
            b_spec = pl.BlockSpec((1, C_pad), lambda i: (0, 0))

        return pl.pallas_call(
            _linear_logsoftmax_kernel,
            out_shape=jax.ShapeDtypeStruct((B_pad, C_pad), jnp.float32),
            grid_spec=pltpu.PrefetchScalarGridSpec(
                num_scalar_prefetch=0,
                grid=grid,
                in_specs=[
                    pl.BlockSpec((TB, D), lambda i: (i, 0)),  # x tile (stream)
                    w_spec,                                   # W (resident)
                    b_spec,                                   # b (resident)
                ],
                out_specs=pl.BlockSpec((TB, C_pad), lambda i: (i, 0)),
            ),
            compiler_params=pltpu.CompilerParams(
                dimension_semantics=("parallel",),  # independent rows -> megacore
                vmem_limit_bytes=vmem_limit,
            ),
            cost_estimate=cost,
        )(x_bf, w_bf, b_p)

    try:
        out = run(w_buffers=1)   # single-buffered constant W / b
    except Exception:
        out = run(w_buffers=2)   # fallback: default double buffering

    return out[:B, :C]


def _reference(x, w, b):
    return jax.nn.log_softmax(x @ w + b, axis=1)


if __name__ == "__main__":
    key = jax.random.PRNGKey(0)
    k_x, k_w, k_b = jax.random.split(key, 3)

    # Small shapes consistent with the module (LINEAR_LOGSOFTMAX forward).
    batch, input_dim, nclass = 8, 32, 16
    x = jax.random.normal(k_x, (batch, input_dim), dtype=jnp.float32)
    bound = 1.0 / jnp.sqrt(jnp.float32(input_dim))  # nn.Linear-style init
    w = jax.random.uniform(k_w, (input_dim, nclass), jnp.float32, -bound, bound)
    b = jax.random.uniform(k_b, (nclass,), jnp.float32, -bound, bound)

    out = linear_logsoftmax(x, w, b)
    jax.block_until_ready(out)
    ref = _reference(x, w, b)
    assert out.shape == (batch, nclass)
    # bf16 MXU inputs -> compare to f32 reference at bf16-level tolerance.
    assert jnp.allclose(out, ref, atol=2e-2, rtol=2e-2), (
        float(jnp.max(jnp.abs(out - ref))))

    # Second check: ragged B and C padding + a multi-step batch grid.
    k2x, k2w, k2b = jax.random.split(jax.random.PRNGKey(1), 3)
    B2, D2, C2 = 300, 160, 200
    x2 = jax.random.normal(k2x, (B2, D2), dtype=jnp.float32)
    w2 = jax.random.normal(k2w, (D2, C2), dtype=jnp.float32) * 0.05
    b2 = jax.random.normal(k2b, (C2,), dtype=jnp.float32) * 0.05
    out2 = linear_logsoftmax(x2, w2, b2)
    jax.block_until_ready(out2)
    ref2 = _reference(x2, w2, b2)
    assert out2.shape == (B2, C2)
    assert jnp.allclose(out2, ref2, atol=2e-2, rtol=2e-2), (
        float(jnp.max(jnp.abs(out2 - ref2))))

    print("KERNEL_OK")
</pallas_src>

<mosaic_0001>
module attributes {stable_mosaic.version = 11 : i64} {
  func.func @_linear_logsoftmax_kernel(%arg0: i32, %arg1: memref<16x32xbf16, #tpu.memory_space<vmem>>, %arg2: memref<32x128xbf16, #tpu.memory_space<vmem>>, %arg3: memref<1x128xf32, #tpu.memory_space<vmem>>, %arg4: memref<16x128xf32, #tpu.memory_space<vmem>>) attributes {dimension_semantics = [#tpu.dimension_semantics<parallel>], iteration_bounds = array<i64: 1>, scalar_prefetch = 0 : i64, scratch_operands = 0 : i64, tpu.core_type = #tpu.core_type<tc>, window_params = [{transform_indices = @transform_0, window_bounds = array<i64: 16, 32>}, {pipeline_mode = #tpu.pipeline_mode<synchronous>, transform_indices = @transform_1, window_bounds = array<i64: 32, 128>}, {pipeline_mode = #tpu.pipeline_mode<synchronous>, transform_indices = @transform_2, window_bounds = array<i64: 1, 128>}, {transform_indices = @transform_3, window_bounds = array<i64: 16, 128>}]} {
    %c0 = arith.constant 0 : index
    %c0_0 = arith.constant 0 : index
    %0 = vector.load %arg1[%c0, %c0_0] : memref<16x32xbf16, #tpu.memory_space<vmem>>, vector<16x32xbf16>
    %c0_1 = arith.constant 0 : index
    %c0_2 = arith.constant 0 : index
    %1 = vector.load %arg2[%c0_1, %c0_2] : memref<32x128xbf16, #tpu.memory_space<vmem>>, vector<32x128xbf16>
    %cst = arith.constant dense<0.000000e+00> : vector<16x128xf32>
    %2 = tpu.matmul %0, %1, %cst {dimension_numbers = #tpu.dot_dimension_numbers<[1], [0], [0], [1], [0, 0, 1, 1], [], []>} : vector<16x32xbf16>, vector<32x128xbf16>, vector<16x128xf32> -> vector<16x128xf32>
    %c0_3 = arith.constant 0 : index
    %c0_4 = arith.constant 0 : index
    %3 = vector.load %arg3[%c0_3, %c0_4] : memref<1x128xf32, #tpu.memory_space<vmem>>, vector<1x128xf32>
    %4 = vector.broadcast %3 : vector<1x128xf32> to vector<16x128xf32>
    %5 = arith.addf %2, %4 : vector<16x128xf32>
    %cst_5 = arith.constant dense<0xFF800000> : vector<16xf32>
    %6 = vector.multi_reduction <maximumf>, %5, %cst_5 [1] : vector<16x128xf32> to vector<16xf32>
    %7 = vector.shape_cast %6 : vector<16xf32> to vector<16x1xf32>
    %8 = vector.broadcast %7 : vector<16x1xf32> to vector<16x128xf32>
    %9 = arith.subf %5, %8 : vector<16x128xf32>
    %10 = math.exp %9 : vector<16x128xf32>
    %cst_6 = arith.constant dense<0.000000e+00> : vector<16xf32>
    %11 = vector.multi_reduction <add>, %10, %cst_6 [1] : vector<16x128xf32> to vector<16xf32>
    %12 = vector.shape_cast %11 : vector<16xf32> to vector<16x1xf32>
    %13 = math.log %12 : vector<16x1xf32>
    %14 = vector.broadcast %13 : vector<16x1xf32> to vector<16x128xf32>
    %15 = arith.subf %9, %14 : vector<16x128xf32>
    %c0_7 = arith.constant 0 : index
    %c0_8 = arith.constant 0 : index
    %16 = vector.load %arg4[%c0_7, %c0_8] : memref<16x128xf32, #tpu.memory_space<vmem>>, vector<16x128xf32>
    tpu.vector_store %arg4[%c0_7, %c0_8], %15 {strides = array<i32>} : memref<16x128xf32, #tpu.memory_space<vmem>>, vector<16x128xf32>,
    return
  }
  func.func @transform_0(%arg0: i32) -> (i32, i32) {
    %c0_i32 = arith.constant 0 : i32
    %c0_i32_0 = arith.constant 0 : i32
    return %arg0, %c0_i32 : i32, i32
  }
  func.func @transform_1(%arg0: i32) -> (i32, i32) {
    %c0_i32 = arith.constant 0 : i32
    %c0_i32_0 = arith.constant 0 : i32
    %c0_i32_1 = arith.constant 0 : i32
    return %c0_i32, %c0_i32_0 : i32, i32
  }
  func.func @transform_2(%arg0: i32) -> (i32, i32) {
    %c0_i32 = arith.constant 0 : i32
    %c0_i32_0 = arith.constant 0 : i32
    %c0_i32_1 = arith.constant 0 : i32
    return %c0_i32, %c0_i32_0 : i32, i32
  }
  func.func @transform_3(%arg0: i32) -> (i32, i32) {
    %c0_i32 = arith.constant 0 : i32
    %c0_i32_0 = arith.constant 0 : i32
    return %arg0, %c0_i32 : i32, i32
  }
}

module attributes {stable_mosaic.version = 11 : i64} {
  func.func @_linear_logsoftmax_kernel(%arg0: i32, %arg1: memref<16x32xbf16, #tpu.memory_space<vmem>>, %arg2: memref<32x128xbf16, #tpu.memory_space<vmem>>, %arg3: memref<1x128xf32, #tpu.memory_space<vmem>>, %arg4: memref<16x128xf32, #tpu.memory_space<vmem>>) attributes {dimension_semantics = [#tpu.dimension_semantics<parallel>], iteration_bounds = array<i64: 1>, scalar_prefetch = 0 : i64, scratch_operands = 0 : i64, tpu.core_type = #tpu.core_type<tc>, window_params = [{transform_indices = @transform_0, window_bounds = array<i64: 16, 32>}, {pipeline_mode = #tpu.pipeline_mode<synchronous>, transform_indices = @transform_1, window_bounds = array<i64: 32, 128>}, {pipeline_mode = #tpu.pipeline_mode<synchronous>, transform_indices = @transform_2, window_bounds = array<i64: 1, 128>}, {transform_indices = @transform_3, window_bounds = array<i64: 16, 128>}]} {
    %c0 = arith.constant 0 : index
    %c0_0 = arith.constant 0 : index
    %0 = vector.load %arg1[%c0, %c0_0] : memref<16x32xbf16, #tpu.memory_space<vmem>>, vector<16x32xbf16>
    %c0_1 = arith.constant 0 : index
    %c0_2 = arith.constant 0 : index
    %1 = vector.load %arg2[%c0_1, %c0_2] : memref<32x128xbf16, #tpu.memory_space<vmem>>, vector<32x128xbf16>
    %cst = arith.constant dense<0.000000e+00> : vector<16x128xf32>
    %2 = tpu.matmul %0, %1, %cst {dimension_numbers = #tpu.dot_dimension_numbers<[1], [0], [0], [1], [0, 0, 1, 1], [], []>} : vector<16x32xbf16>, vector<32x128xbf16>, vector<16x128xf32> -> vector<16x128xf32>
    %c0_3 = arith.constant 0 : index
    %c0_4 = arith.constant 0 : index
    %3 = vector.load %arg3[%c0_3, %c0_4] : memref<1x128xf32, #tpu.memory_space<vmem>>, vector<1x128xf32>
    %4 = vector.broadcast %3 : vector<1x128xf32> to vector<16x128xf32>
    %5 = arith.addf %2, %4 : vector<16x128xf32>
    %cst_5 = arith.constant dense<0xFF800000> : vector<16xf32>
    %6 = vector.multi_reduction <maximumf>, %5, %cst_5 [1] : vector<16x128xf32> to vector<16xf32>
    %7 = vector.shape_cast %6 : vector<16xf32> to vector<16x1xf32>
    %8 = vector.broadcast %7 : vector<16x1xf32> to vector<16x128xf32>
    %9 = arith.subf %5, %8 : vector<16x128xf32>
    %10 = math.exp %9 : vector<16x128xf32>
    %cst_6 = arith.constant dense<0.000000e+00> : vector<16xf32>
    %11 = vector.multi_reduction <add>, %10, %cst_6 [1] : vector<16x128xf32> to vector<16xf32>
    %12 = vector.shape_cast %11 : vector<16xf32> to vector<16x1xf32>
    %13 = math.log %12 : vector<16x1xf32>
    %14 = vector.broadcast %13 : vector<16x1xf32> to vector<16x128xf32>
    %15 = arith.subf %9, %14 : vector<16x128xf32>
    %c0_7 = arith.constant 0 : index
    %c0_8 = arith.constant 0 : index
    %16 = vector.load %arg4[%c0_7, %c0_8] : memref<16x128xf32, #tpu.memory_space<vmem>>, vector<16x128xf32>
    tpu.vector_store %arg4[%c0_7, %c0_8], %15 {strides = array<i32>} : memref<16x128xf32, #tpu.memory_space<vmem>>, vector<16x128xf32>,
    return
  }
  func.func @transform_0(%arg0: i32) -> (i32, i32) {
    %c0_i32 = arith.constant 0 : i32
    %c0_i32_0 = arith.constant 0 : i32
    return %arg0, %c0_i32 : i32, i32
  }
  func.func @transform_1(%arg0: i32) -> (i32, i32) {
    %c0_i32 = arith.constant 0 : i32
    %c0_i32_0 = arith.constant 0 : i32
    %c0_i32_1 = arith.constant 0 : i32
    return %c0_i32, %c0_i32_0 : i32, i32
  }
  func.func @transform_2(%arg0: i32) -> (i32, i32) {
    %c0_i32 = arith.constant 0 : i32
    %c0_i32_0 = arith.constant 0 : i32
    %c0_i32_1 = arith.constant 0 : i32
    return %c0_i32, %c0_i32_0 : i32, i32
  }
  func.func @transform_3(%arg0: i32) -> (i32, i32) {
    %c0_i32 = arith.constant 0 : i32
    %c0_i32_0 = arith.constant 0 : i32
    return %arg0, %c0_i32 : i32, i32
  }
}

</mosaic_0001>

<bundles_post_ra>
// kernel: tpu_custom_call.1
= control target key start
LH: loop header
LB: loop body
LE: loop exit
PB: predicated region body
PF: predicated region fallthrough
CT: control target
= control target key end

     0   :  { %8 = vsyncpa [#allocation3], 0  ;;  %s302_s0 = inlined_call_operand.hbm [shape: bf16[16,32], index: 0, kind: input, shape index: {}]   ;;  %s303_s1 = inlined_call_operand.hbm [shape: bf16[32,128], index: 1, kind: input, shape index: {}]   ;;  %s304_s2 = inlined_call_operand.vmem [shape: f32[1,128], index: 2, kind: input, shape index: {}]   ;;  %s305_s3 = inlined_call_operand.hbm [shape: f32[16,128], index: 3, kind: output, shape index: {}]  }
   0x1   :  { %9 = vsyncpa [#allocation6], 0 }
   0x2   :  { %10 = vsyncpa [#allocation4], 0  ;;  %s261_s12 = smov [#allocation2]  }
   0x3   :  { %s16_s13 = sshll.u32 %s261_s12, 4  ;;  %s17_s13 = int_to_ptr.vmem [resolvable:$true] %s16_s13 }
   0x4   :  { %s203_s14 = scalar_lea.vmem %s17_s13, 128  ;;  %p208_p1 = scmp.lt.s32.totalorder %s17_s13, %s17_s13 }
   0x5   :  { %p204_p0 = scmp.ne.s32.totalorder %s17_s13, %s203_s14  ;;  %p209_p2 = scmp.lt.s32.totalorder %s203_s14, %s203_s14 }
   0x7   :  { %p210_p3 = por %p209_p2, %p208_p1 }
   0x9   :  { %p211_p4 = pnand %p210_p3, %p204_p0 }
   0xb   :  { %214 = shalt.err (!%p211_p4)
}
   0xc   :  { %s262_s15 = smov 64   ;;  %s263_s16 = smov 4  }
   0xd   :  { %22 = dma.hbm_to_vmem [thread:$0]  %s302_s0, 128, %s17_s13, [#allocation3], %s262_s15, %s262_s15, %s263_s16  }
   0xe   :  { %s264_s19 = smov [#allocation5]  }
   0xf   :  { %s28_s20 = sshll.u32 %s264_s19, 4  ;;  %s29_s20 = int_to_ptr.vmem [resolvable:$true] %s28_s20 }
  0x10   :  { %s223_s21 = scalar_lea.vmem %s29_s20, 256  ;;  %p228_p6 = scmp.lt.s32.totalorder %s29_s20, %s29_s20 }
  0x11   :  { %p224_p5 = scmp.ne.s32.totalorder %s29_s20, %s223_s21  ;;  %p229_p7 = scmp.lt.s32.totalorder %s223_s21, %s223_s21 }
  0x13   :  { %p230_p8 = por %p229_p7, %p228_p6 }
  0x15   :  { %p231_p9 = pnand %p230_p8, %p224_p5 }
  0x17   :  { %234 = shalt.err (!%p231_p9)
}
  0x18   :  { %34 = dma.hbm_to_vmem [thread:$0]  %s303_s1, 256, %s29_s20, [#allocation6], %s262_s15, %s262_s15, %s263_s16  }
  0x19   :  { %255 = dma.done.wait [#allocation3], 128  }
  0x1a   :  { %256 = vsyncadd [#allocation3], 4294967168 }
  0x1b   :  { %257 = dma.done.wait [#allocation6], 256  }
  0x1c   :  { %258 = vsyncadd [#allocation6], 4294967040  ;;  %v265_v0 = vmov 0.0   ;;  %vm266_vm0 = vmmov 0   ;;  %v184_v1 = vld [vmem:[#allocation5 + $0x8] sm:$0xff]   ;;  %v185_v2 = vld [vmem:[#allocation5] sm:$0xff]  }
  0x1d   :  { %167 = vmatprep.subr.bf16.mxu0 %v265_v0  ;;  %171 = vmatprep.mubr.msk.bf16.mxu0 %vm266_vm0, %v265_v0  ;;  %v186_v3 = vld [vmem:[#allocation2] sm:$0xff]   ;;  %vm74_vm1 = vcmask 261120   ;;  %s267_s1 = smov [#allocation7]  }
  0x1e   :  { %168 = vmatpush3.bf16.msra.mxu0 %v184_v1  ;;  %v159_v4 = vld [vmem:[%s304_s2] ss:$0 sm:$0xff]  ;;  %s146_s2 = sshll.u32 %s267_s1, 4  ;;  %s147_s2 = int_to_ptr.vmem [resolvable:$true] %s146_s2 }
  0x1f   :  { %169 = vmatprep.subr.bf16.mxu0 %v265_v0  ;;  %s235_s25 = scalar_lea.vmem %s147_s2, 256  ;;  %p240_p11 = scmp.lt.s32.totalorder %s147_s2, %s147_s2 }
  0x20   :  { %p236_p10 = scmp.ne.s32.totalorder %s147_s2, %s235_s25  ;;  %p241_p12 = scmp.lt.s32.totalorder %s235_s25, %s235_s25 }
  0x22   :  { %170 = vmatpush3.bf16.msra.mxu0 %v185_v2  ;;  %p242_p13 = por %p241_p12, %p240_p11 }
  0x24   :  { %p243_p0 = pnand %p242_p13, %p236_p10 }
  0x25   :  { %172 = vmatmul.mubr.msk.bf16.vlgmr.msra.gmra.mxu0 %vm74_vm1, %v186_v3 }
  0xe5   :  { %v112_v5 = vpop.f32.mrf.mxu0 }
  0xe6   :  { %v113_v6 = vadd.f32 %v159_v4, %v112_v5 }
  0xe7   :  { %v173_v7 = vpop.f32.mrf.mxu0 }
  0xe8   :  { %119 = vmax.xlane.f32.xlu0 %v113_v6 }
  0xe9   :  { %v115_v8 = vpop.f32.mrf.mxu0 }
  0xea   :  { %v116_v9 = vadd.f32 %v159_v4, %v115_v8 }
  0xeb   :  { %v174_v10 = vpop.f32.mrf.mxu0 }
  0xec   :  { %121 = vmax.xlane.f32.xlu0 %v116_v9 }
 0x171   :  { %v120_v11 = vpop.xlane.xlu0 %119 }
 0x172   :  { %v123_v12 = vsub.f32 %v113_v6, %v120_v11 }
 0x174   :  { %v125_v13 = vmul.f32 1.442695, %v123_v12 }
 0x175   :  { %v122_v14 = vpop.xlane.xlu0 %121 }
 0x176   :  { %v124_v15 = vsub.f32 %v116_v9, %v122_v14  ;;  %187 = vpow2.f32 %v125_v13 }
 0x178   :  { %v127_v16 = vmul.f32 1.442695, %v124_v15 }
 0x17a   :  { %189 = vpow2.f32 %v127_v16 }
 0x183   :  { %v188_v17 = vpop.eup %187 }
 0x184   :  { %129 = vadd.xlane.f32.xlu1 %v188_v17 }
 0x187   :  { %v190_v18 = vpop.eup %189 }
 0x188   :  { %131 = vadd.xlane.f32.xlu1 %v190_v18 }
 0x20d   :  { %v130_v19 = vpop.xlane.xlu1 %129 }
 0x20e   :  { %191 = vlog2.f32 %v130_v19 }
 0x211   :  { %v132_v20 = vpop.xlane.xlu1 %131 }
 0x212   :  { %193 = vlog2.f32 %v132_v20 }
 0x21b   :  { %v192_v21 = vpop.eup %191 }
 0x21c   :  { %v134_v22 = vmul.f32 0.6931472, %v192_v21 }
 0x21e   :  { %v137_v23 = vsub.f32 %v123_v12, %v134_v22 }
 0x21f   :  { %v194_v24 = vpop.eup %193 }
 0x220   :  { %139 = vst [vmem:[#allocation7] sm:$0xff] %v137_v23  ;;  %v136_v25 = vmul.f32 0.6931472, %v194_v24 }
 0x222   :  { %v138_v26 = vsub.f32 %v124_v15, %v136_v25 }
 0x224   :  { %140 = vst [vmem:[#allocation7 + $0x8] sm:$0xff] %v138_v26 }
 0x225   :  { %246 = shalt.err (!%p243_p0)
}
 0x226   :  { %s268_s26 = smov 128   ;;  %s269_s27 = smov 8  }
 0x227   :  { %152 = dma.vmem_to_hbm [thread:$0]  %s147_s2, 256, %s305_s3, [#allocation4], %s268_s26, %s268_s26, %s269_s27  }
 0x228   :  { %259 = dma.done.wait [#allocation4], 256  }
 0x229   :  { %260 = vsyncadd [#allocation4], 4294967040 }
 0x22a   :  { %156 = vsyncpa [#allocation3], 1 }
 0x22b   :  { %157 = vsyncpa [#allocation6], 1 }
 0x22c   :  { %158 = vsyncpa [#allocation4], 1 }

// kernel: tpu_custom_call.1
= control target key start
LH: loop header
LB: loop body
LE: loop exit
PB: predicated region body
PF: predicated region fallthrough
CT: control target
= control target key end

     0   :  { %8 = vsyncpa [#allocation3], 0  ;;  %s302_s0 = inlined_call_operand.hbm [shape: bf16[16,32], index: 0, kind: input, shape index: {}]   ;;  %s303_s1 = inlined_call_operand.hbm [shape: bf16[32,128], index: 1, kind: input, shape index: {}]   ;;  %s304_s2 = inlined_call_operand.vmem [shape: f32[1,128], index: 2, kind: input, shape index: {}]   ;;  %s305_s3 = inlined_call_operand.hbm [shape: f32[16,128], index: 3, kind: output, shape index: {}]  }
   0x1   :  { %9 = vsyncpa [#allocation6], 0 }
   0x2   :  { %10 = vsyncpa [#allocation4], 0  ;;  %s261_s12 = smov [#allocation2]  }
   0x3   :  { %s16_s13 = sshll.u32 %s261_s12, 4  ;;  %s17_s13 = int_to_ptr.vmem [resolvable:$true] %s16_s13 }
   0x4   :  { %s203_s14 = scalar_lea.vmem %s17_s13, 128  ;;  %p208_p1 = scmp.lt.s32.totalorder %s17_s13, %s17_s13 }
   0x5   :  { %p204_p0 = scmp.ne.s32.totalorder %s17_s13, %s203_s14  ;;  %p209_p2 = scmp.lt.s32.totalorder %s203_s14, %s203_s14 }
   0x7   :  { %p210_p3 = por %p209_p2, %p208_p1 }
   0x9   :  { %p211_p4 = pnand %p210_p3, %p204_p0 }
   0xb   :  { %214 = shalt.err (!%p211_p4)
}
   0xc   :  { %s262_s15 = smov 64   ;;  %s263_s16 = smov 4  }
   0xd   :  { %22 = dma.hbm_to_vmem [thread:$0]  %s302_s0, 128, %s17_s13, [#allocation3], %s262_s15, %s262_s15, %s263_s16  }
   0xe   :  { %s264_s19 = smov [#allocation5]  }
   0xf   :  { %s28_s20 = sshll.u32 %s264_s19, 4  ;;  %s29_s20 = int_to_ptr.vmem [resolvable:$true] %s28_s20 }
  0x10   :  { %s223_s21 = scalar_lea.vmem %s29_s20, 256  ;;  %p228_p6 = scmp.lt.s32.totalorder %s29_s20, %s29_s20 }
  0x11   :  { %p224_p5 = scmp.ne.s32.totalorder %s29_s20, %s223_s21  ;;  %p229_p7 = scmp.lt.s32.totalorder %s223_s21, %s223_s21 }
  0x13   :  { %p230_p8 = por %p229_p7, %p228_p6 }
  0x15   :  { %p231_p9 = pnand %p230_p8, %p224_p5 }
  0x17   :  { %234 = shalt.err (!%p231_p9)
}
  0x18   :  { %34 = dma.hbm_to_vmem [thread:$0]  %s303_s1, 256, %s29_s20, [#allocation6], %s262_s15, %s262_s15, %s263_s16  }
  0x19   :  { %255 = dma.done.wait [#allocation3], 128  }
  0x1a   :  { %256 = vsyncadd [#allocation3], 4294967168 }
  0x1b   :  { %257 = dma.done.wait [#allocation6], 256  }
  0x1c   :  { %258 = vsyncadd [#allocation6], 4294967040  ;;  %v265_v0 = vmov 0.0   ;;  %vm266_vm0 = vmmov 0   ;;  %v184_v1 = vld [vmem:[#allocation5 + $0x8] sm:$0xff]   ;;  %v185_v2 = vld [vmem:[#allocation5] sm:$0xff]  }
  0x1d   :  { %167 = vmatprep.subr.bf16.mxu0 %v265_v0  ;;  %171 = vmatprep.mubr.msk.bf16.mxu0 %vm266_vm0, %v265_v0  ;;  %v186_v3 = vld [vmem:[#allocation2] sm:$0xff]   ;;  %vm74_vm1 = vcmask 261120   ;;  %s267_s1 = smov [#allocation7]  }
  0x1e   :  { %168 = vmatpush3.bf16.msra.mxu0 %v184_v1  ;;  %v159_v4 = vld [vmem:[%s304_s2] ss:$0 sm:$0xff]  ;;  %s146_s2 = sshll.u32 %s267_s1, 4  ;;  %s147_s2 = int_to_ptr.vmem [resolvable:$true] %s146_s2 }
  0x1f   :  { %169 = vmatprep.subr.bf16.mxu0 %v265_v0  ;;  %s235_s25 = scalar_lea.vmem %s147_s2, 256  ;;  %p240_p11 = scmp.lt.s32.totalorder %s147_s2, %s147_s2 }
  0x20   :  { %p236_p10 = scmp.ne.s32.totalorder %s147_s2, %s235_s25  ;;  %p241_p12 = scmp.lt.s32.totalorder %s235_s25, %s235_s25 }
  0x22   :  { %170 = vmatpush3.bf16.msra.mxu0 %v185_v2  ;;  %p242_p13 = por %p241_p12, %p240_p11 }
  0x24   :  { %p243_p0 = pnand %p242_p13, %p236_p10 }
  0x25   :  { %172 = vmatmul.mubr.msk.bf16.vlgmr.msra.gmra.mxu0 %vm74_vm1, %v186_v3 }
  0xe5   :  { %v112_v5 = vpop.f32.mrf.mxu0 }
  0xe6   :  { %v113_v6 = vadd.f32 %v159_v4, %v112_v5 }
  0xe7   :  { %v173_v7 = vpop.f32.mrf.mxu0 }
  0xe8   :  { %119 = vmax.xlane.f32.xlu0 %v113_v6 }
  0xe9   :  { %v115_v8 = vpop.f32.mrf.mxu0 }
  0xea   :  { %v116_v9 = vadd.f32 %v159_v4, %v115_v8 }
  0xeb   :  { %v174_v10 = vpop.f32.mrf.mxu0 }
  0xec   :  { %121 = vmax.xlane.f32.xlu0 %v116_v9 }
 0x171   :  { %v120_v11 = vpop.xlane.xlu0 %119 }
 0x172   :  { %v123_v12 = vsub.f32 %v113_v6, %v120_v11 }
 0x174   :  { %v125_v13 = vmul.f32 1.442695, %v123_v12 }
 0x175   :  { %v122_v14 = vpop.xlane.xlu0 %121 }
 0x176   :  { %v124_v15 = vsub.f32 %v116_v9, %v122_v14  ;;  %187 = vpow2.f32 %v125_v13 }
 0x178   :  { %v127_v16 = vmul.f32 1.442695, %v124_v15 }
 0x17a   :  { %189 = vpow2.f32 %v127_v16 }
 0x183   :  { %v188_v17 = vpop.eup %187 }
 0x184   :  { %129 = vadd.xlane.f32.xlu1 %v188_v17 }
 0x187   :  { %v190_v18 = vpop.eup %189 }
 0x188   :  { %131 = vadd.xlane.f32.xlu1 %v190_v18 }
 0x20d   :  { %v130_v19 = vpop.xlane.xlu1 %129 }
 0x20e   :  { %191 = vlog2.f32 %v130_v19 }
 0x211   :  { %v132_v20 = vpop.xlane.xlu1 %131 }
 0x212   :  { %193 = vlog2.f32 %v132_v20 }
 0x21b   :  { %v192_v21 = vpop.eup %191 }
 0x21c   :  { %v134_v22 = vmul.f32 0.6931472, %v192_v21 }
 0x21e   :  { %v137_v23 = vsub.f32 %v123_v12, %v134_v22 }
 0x21f   :  { %v194_v24 = vpop.eup %193 }
 0x220   :  { %139 = vst [vmem:[#allocation7] sm:$0xff] %v137_v23  ;;  %v136_v25 = vmul.f32 0.6931472, %v194_v24 }
 0x222   :  { %v138_v26 = vsub.f32 %v124_v15, %v136_v25 }
 0x224   :  { %140 = vst [vmem:[#allocation7 + $0x8] sm:$0xff] %v138_v26 }
 0x225   :  { %246 = shalt.err (!%p243_p0)
}
 0x226   :  { %s268_s26 = smov 128   ;;  %s269_s27 = smov 8  }
 0x227   :  { %152 = dma.vmem_to_hbm [thread:$0]  %s147_s2, 256, %s305_s3, [#allocation4], %s268_s26, %s268_s26, %s269_s27  }
 0x228   :  { %259 = dma.done.wait [#allocation4], 256  }
 0x229   :  { %260 = vsyncadd [#allocation4], 4294967040 }
 0x22a   :  { %156 = vsyncpa [#allocation3], 1 }
 0x22b   :  { %157 = vsyncpa [#allocation6], 1 }
 0x22c   :  { %158 = vsyncpa [#allocation4], 1 }

</bundles_post_ra>
